<compile_context>
chip_gen: v7x
topology: tpu7x:2x2x1
jax: 0.10.0
libtpu: 0.0.40
codegen_flags: <defaults>
</compile_context>

<pallas_src>
import jax
import jax.numpy as jnp
from jax.experimental import pallas as pl
from jax.experimental.pallas import tpu as pltpu


NEG_INF = -1e9  # pad-logit bias; exp(NEG_INF - max) underflows to exactly 0 in f32


def mlp_kernel(x_ref, w1_ref, b1_ref, w2_ref, b2_ref, w3_ref, b3_ref, o_ref):
    """One batch tile: 3 matmuls (bf16 operands, f32 MXU acc) + ReLU + softmax.

    Class axis is padded to 128 lanes (zero weight cols + NEG_INF bias), so the
    output store is lane-dense and the padded columns vanish in the softmax.
    """
    x = x_ref[...]  # (TB, 896) bf16

    h1 = jnp.dot(x, w1_ref[...], preferred_element_type=jnp.float32) + b1_ref[...]
    h1 = jnp.maximum(h1, 0.0).astype(jnp.bfloat16)

    h2 = jnp.dot(h1, w2_ref[...], preferred_element_type=jnp.float32) + b2_ref[...]
    h2 = jnp.maximum(h2, 0.0).astype(jnp.bfloat16)

    # (TB, 128) logits; columns 10..127 are exactly NEG_INF.
    logits = jnp.dot(h2, w3_ref[...], preferred_element_type=jnp.float32) + b3_ref[...]

    # Numerically-stabilized softmax over dim=1; exact division so rows sum to 1.
    m = jnp.max(logits, axis=-1, keepdims=True)
    e = jnp.exp(logits - m)
    denom = jnp.sum(e, axis=-1, keepdims=True)
    o_ref[...] = e / denom


def _round_up(x, m):
    return ((x + m - 1) // m) * m


def net_forward(x_nchw, params, *, block_b=1024):
    """x_nchw: (B, 1, 28, 28) float32. Returns (B, 10) softmax probabilities."""
    w1, b1, w2, b2, w3, b3 = params
    B = x_nchw.shape[0]
    hidden = w1.shape[1]      # 256
    n_classes = w3.shape[1]   # 10

    k_pad = 896   # 784 -> 7*128 lane-aligned K for layer 1 (zero pad, exact)
    c_pad = 128   # 10 -> 128 lane-dense class axis for the output store

    # Batch tiling: pad B to a multiple of 16 (bf16 sublane packing), split into
    # tiles of <= block_b, prefer >=2 grid steps (v7x megacore) when possible,
    # and pad only up to steps*tb (waste <= one 16-row round-up per tile).
    b16 = _round_up(B, 16)
    steps = max(1, -(-b16 // block_b))       # cdiv(b16, block_b)
    if steps == 1 and b16 >= 64:
        steps = 2
    tb = _round_up(-(-b16 // steps), 16)
    b_padded = steps * tb

    # nn.Flatten; cast to bf16 first, then pad rows (batch) and cols (K) in one pass.
    x2d = x_nchw.reshape(B, -1).astype(jnp.bfloat16)
    x_bf = jnp.pad(x2d, ((0, b_padded - B), (0, k_pad - x2d.shape[1])))

    # Weights as (in, out); zero-pad K of layer 1 and the class axis of layer 3.
    w1b = jnp.pad(w1, ((0, k_pad - w1.shape[0]), (0, 0))).astype(jnp.bfloat16)
    w2b = w2.astype(jnp.bfloat16)
    w3b = jnp.pad(w3, ((0, 0), (0, c_pad - n_classes))).astype(jnp.bfloat16)
    # Pad logits are driven to NEG_INF via the bias so they exp to exactly 0.
    b3p = jnp.pad(b3, ((0, 0), (0, c_pad - n_classes)), constant_values=NEG_INF)

    flops = 2 * b_padded * (k_pad * hidden + hidden * hidden + hidden * c_pad)
    bytes_accessed = (
        x_bf.size * 2
        + (w1b.size + w2b.size + w3b.size) * 2
        + (b1.size + b2.size + b3p.size) * 4
        + b_padded * c_pad * 4
    )

    out = pl.pallas_call(
        mlp_kernel,
        out_shape=jax.ShapeDtypeStruct((b_padded, c_pad), jnp.float32),
        grid=(steps,),
        in_specs=[
            # x: pipelined over the batch grid (auto double-buffered HBM->VMEM).
            pl.BlockSpec((tb, k_pad), lambda i: (i, 0)),
            # weights / biases: constant index_map -> fetched once, resident in
            # VMEM across grid steps (no per-step re-DMA).
            pl.BlockSpec(w1b.shape, lambda i: (0, 0)),
            pl.BlockSpec(b1.shape, lambda i: (0, 0)),
            pl.BlockSpec(w2b.shape, lambda i: (0, 0)),
            pl.BlockSpec(b2.shape, lambda i: (0, 0)),
            pl.BlockSpec(w3b.shape, lambda i: (0, 0)),
            pl.BlockSpec(b3p.shape, lambda i: (0, 0)),
        ],
        out_specs=pl.BlockSpec((tb, c_pad), lambda i: (i, 0)),
        compiler_params=pltpu.CompilerParams(
            dimension_semantics=("parallel",),
            # Headroom for tb up to ~2K; below physical VMEM on v5e/v6e/v7x.
            vmem_limit_bytes=48 * 1024 * 1024,
        ),
        cost_estimate=pl.CostEstimate(
            flops=flops,
            transcendentals=b_padded * c_pad,
            bytes_accessed=bytes_accessed,
        ),
    )(x_bf, w1b, b1, w2b, b2, w3b, b3p)

    return out[:B, :n_classes]


def init_params(key):
    """Deterministic init mimicking nn.Linear default (uniform ±1/sqrt(fan_in)).
    Weights stored as (in_features, out_features)."""
    def linear(key, fan_in, fan_out):
        kw, kb = jax.random.split(key)
        bound = 1.0 / jnp.sqrt(fan_in)
        w = jax.random.uniform(kw, (fan_in, fan_out), jnp.float32, -bound, bound)
        b = jax.random.uniform(kb, (1, fan_out), jnp.float32, -bound, bound)
        return w, b

    k1, k2, k3 = jax.random.split(key, 3)
    w1, b1 = linear(k1, 784, 256)
    w2, b2 = linear(k2, 256, 256)
    w3, b3 = linear(k3, 256, 10)
    return (w1, b1, w2, b2, w3, b3)


def reference_forward_f32(x_nchw, params):
    """Pure-JAX f32 reference (exact PyTorch semantics)."""
    w1, b1, w2, b2, w3, b3 = params
    x = x_nchw.reshape(x_nchw.shape[0], -1)
    h1 = jnp.maximum(x @ w1 + b1, 0.0)
    h2 = jnp.maximum(h1 @ w2 + b2, 0.0)
    logits = h2 @ w3 + b3
    return jax.nn.softmax(logits, axis=1)


def reference_forward_bf16(x_nchw, params):
    """Pure-JAX reference mirroring the kernel's bf16-operand / f32-accumulate path."""
    w1, b1, w2, b2, w3, b3 = params
    x = x_nchw.reshape(x_nchw.shape[0], -1).astype(jnp.bfloat16)
    w1b, w2b, w3b = (w.astype(jnp.bfloat16) for w in (w1, w2, w3))
    h1 = jnp.maximum(jnp.dot(x, w1b, preferred_element_type=jnp.float32) + b1, 0.0)
    h2 = jnp.maximum(
        jnp.dot(h1.astype(jnp.bfloat16), w2b, preferred_element_type=jnp.float32) + b2, 0.0
    )
    logits = jnp.dot(h2.astype(jnp.bfloat16), w3b, preferred_element_type=jnp.float32) + b3
    return jax.nn.softmax(logits, axis=1)


if __name__ == "__main__":
    key = jax.random.PRNGKey(0)
    kx, kp = jax.random.split(key)

    B = 8
    x = jax.random.normal(kx, (B, 1, 28, 28), jnp.float32)  # MNIST-shaped NCHW
    params = init_params(kp)

    out = net_forward(x, params)
    out = jax.block_until_ready(out)

    ref_bf = reference_forward_bf16(x, params)
    ref_f32 = reference_forward_f32(x, params)

    assert out.shape == (B, 10)
    # Matches the bf16-operand reference path tightly.
    assert jnp.allclose(out, ref_bf, atol=1e-3, rtol=1e-3)
    # Stays close to the exact f32 PyTorch semantics.
    assert jnp.allclose(out, ref_f32, atol=2e-2, rtol=2e-2)
    # Softmax rows sum to 1 (exact division in the kernel).
    assert jnp.allclose(jnp.sum(out, axis=1), jnp.ones((B,)), atol=1e-3)

    print("KERNEL_OK")
</pallas_src>

<mosaic_0001>
module attributes {stable_mosaic.version = 11 : i64} {
  func.func @mlp_kernel(%arg0: i32, %arg1: memref<16x896xbf16, #tpu.memory_space<vmem>>, %arg2: memref<896x256xbf16, #tpu.memory_space<vmem>>, %arg3: memref<1x256xf32, #tpu.memory_space<vmem>>, %arg4: memref<256x256xbf16, #tpu.memory_space<vmem>>, %arg5: memref<1x256xf32, #tpu.memory_space<vmem>>, %arg6: memref<256x128xbf16, #tpu.memory_space<vmem>>, %arg7: memref<1x128xf32, #tpu.memory_space<vmem>>, %arg8: memref<16x128xf32, #tpu.memory_space<vmem>>) attributes {dimension_semantics = [#tpu.dimension_semantics<parallel>], iteration_bounds = array<i64: 1>, scalar_prefetch = 0 : i64, scratch_operands = 0 : i64, tpu.core_type = #tpu.core_type<tc>, window_params = [{transform_indices = @transform_0, window_bounds = array<i64: 16, 896>}, {pipeline_mode = #tpu.pipeline_mode<synchronous>, transform_indices = @transform_1, window_bounds = array<i64: 896, 256>}, {pipeline_mode = #tpu.pipeline_mode<synchronous>, transform_indices = @transform_2, window_bounds = array<i64: 1, 256>}, {pipeline_mode = #tpu.pipeline_mode<synchronous>, transform_indices = @transform_3, window_bounds = array<i64: 256, 256>}, {pipeline_mode = #tpu.pipeline_mode<synchronous>, transform_indices = @transform_4, window_bounds = array<i64: 1, 256>}, {pipeline_mode = #tpu.pipeline_mode<synchronous>, transform_indices = @transform_5, window_bounds = array<i64: 256, 128>}, {pipeline_mode = #tpu.pipeline_mode<synchronous>, transform_indices = @transform_6, window_bounds = array<i64: 1, 128>}, {transform_indices = @transform_7, window_bounds = array<i64: 16, 128>}]} {
    %c0 = arith.constant 0 : index
    %c0_0 = arith.constant 0 : index
    %0 = vector.load %arg1[%c0, %c0_0] : memref<16x896xbf16, #tpu.memory_space<vmem>>, vector<16x896xbf16>
    %c0_1 = arith.constant 0 : index
    %c0_2 = arith.constant 0 : index
    %1 = vector.load %arg2[%c0_1, %c0_2] : memref<896x256xbf16, #tpu.memory_space<vmem>>, vector<896x256xbf16>
    %cst = arith.constant dense<0.000000e+00> : vector<16x256xf32>
    %2 = tpu.matmul %0, %1, %cst {dimension_numbers = #tpu.dot_dimension_numbers<[1], [0], [0], [1], [0, 0, 1, 1], [], []>} : vector<16x896xbf16>, vector<896x256xbf16>, vector<16x256xf32> -> vector<16x256xf32>
    %c0_3 = arith.constant 0 : index
    %c0_4 = arith.constant 0 : index
    %3 = vector.load %arg3[%c0_3, %c0_4] : memref<1x256xf32, #tpu.memory_space<vmem>>, vector<1x256xf32>
    %4 = vector.broadcast %3 : vector<1x256xf32> to vector<16x256xf32>
    %5 = arith.addf %2, %4 : vector<16x256xf32>
    %cst_5 = arith.constant 0.000000e+00 : f32
    %6 = vector.broadcast %cst_5 : f32 to vector<16x256xf32>
    %7 = arith.maximumf %5, %6 : vector<16x256xf32>
    %8 = arith.truncf %7 : vector<16x256xf32> to vector<16x256xbf16>
    %c0_6 = arith.constant 0 : index
    %c0_7 = arith.constant 0 : index
    %9 = vector.load %arg4[%c0_6, %c0_7] : memref<256x256xbf16, #tpu.memory_space<vmem>>, vector<256x256xbf16>
    %cst_8 = arith.constant dense<0.000000e+00> : vector<16x256xf32>
    %10 = tpu.matmul %8, %9, %cst_8 {dimension_numbers = #tpu.dot_dimension_numbers<[1], [0], [0], [1], [0, 0, 1, 1], [], []>} : vector<16x256xbf16>, vector<256x256xbf16>, vector<16x256xf32> -> vector<16x256xf32>
    %c0_9 = arith.constant 0 : index
    %c0_10 = arith.constant 0 : index
    %11 = vector.load %arg5[%c0_9, %c0_10] : memref<1x256xf32, #tpu.memory_space<vmem>>, vector<1x256xf32>
    %12 = vector.broadcast %11 : vector<1x256xf32> to vector<16x256xf32>
    %13 = arith.addf %10, %12 : vector<16x256xf32>
    %cst_11 = arith.constant 0.000000e+00 : f32
    %14 = vector.broadcast %cst_11 : f32 to vector<16x256xf32>
    %15 = arith.maximumf %13, %14 : vector<16x256xf32>
    %16 = arith.truncf %15 : vector<16x256xf32> to vector<16x256xbf16>
    %c0_12 = arith.constant 0 : index
    %c0_13 = arith.constant 0 : index
    %17 = vector.load %arg6[%c0_12, %c0_13] : memref<256x128xbf16, #tpu.memory_space<vmem>>, vector<256x128xbf16>
    %cst_14 = arith.constant dense<0.000000e+00> : vector<16x128xf32>
    %18 = tpu.matmul %16, %17, %cst_14 {dimension_numbers = #tpu.dot_dimension_numbers<[1], [0], [0], [1], [0, 0, 1, 1], [], []>} : vector<16x256xbf16>, vector<256x128xbf16>, vector<16x128xf32> -> vector<16x128xf32>
    %c0_15 = arith.constant 0 : index
    %c0_16 = arith.constant 0 : index
    %19 = vector.load %arg7[%c0_15, %c0_16] : memref<1x128xf32, #tpu.memory_space<vmem>>, vector<1x128xf32>
    %20 = vector.broadcast %19 : vector<1x128xf32> to vector<16x128xf32>
    %21 = arith.addf %18, %20 : vector<16x128xf32>
    %cst_17 = arith.constant dense<0xFF800000> : vector<16xf32>
    %22 = vector.multi_reduction <maximumf>, %21, %cst_17 [1] : vector<16x128xf32> to vector<16xf32>
    %23 = vector.shape_cast %22 : vector<16xf32> to vector<16x1xf32>
    %24 = vector.broadcast %23 : vector<16x1xf32> to vector<16x128xf32>
    %25 = arith.subf %21, %24 : vector<16x128xf32>
    %26 = math.exp %25 : vector<16x128xf32>
    %cst_18 = arith.constant dense<0.000000e+00> : vector<16xf32>
    %27 = vector.multi_reduction <add>, %26, %cst_18 [1] : vector<16x128xf32> to vector<16xf32>
    %28 = vector.shape_cast %27 : vector<16xf32> to vector<16x1xf32>
    %29 = vector.broadcast %28 : vector<16x1xf32> to vector<16x128xf32>
    %30 = arith.divf %26, %29 : vector<16x128xf32>
    %c0_19 = arith.constant 0 : index
    %c0_20 = arith.constant 0 : index
    %31 = vector.load %arg8[%c0_19, %c0_20] : memref<16x128xf32, #tpu.memory_space<vmem>>, vector<16x128xf32>
    tpu.vector_store %arg8[%c0_19, %c0_20], %30 {strides = array<i32>} : memref<16x128xf32, #tpu.memory_space<vmem>>, vector<16x128xf32>,
    return
  }
  func.func @transform_0(%arg0: i32) -> (i32, i32) {
    %c0_i32 = arith.constant 0 : i32
    %c0_i32_0 = arith.constant 0 : i32
    return %arg0, %c0_i32 : i32, i32
  }
  func.func @transform_1(%arg0: i32) -> (i32, i32) {
    %c0_i32 = arith.constant 0 : i32
    %c0_i32_0 = arith.constant 0 : i32
    %c0_i32_1 = arith.constant 0 : i32
    return %c0_i32, %c0_i32_0 : i32, i32
  }
  func.func @transform_2(%arg0: i32) -> (i32, i32) {
    %c0_i32 = arith.constant 0 : i32
    %c0_i32_0 = arith.constant 0 : i32
    %c0_i32_1 = arith.constant 0 : i32
    return %c0_i32, %c0_i32_0 : i32, i32
  }
  func.func @transform_3(%arg0: i32) -> (i32, i32) {
    %c0_i32 = arith.constant 0 : i32
    %c0_i32_0 = arith.constant 0 : i32
    %c0_i32_1 = arith.constant 0 : i32
    return %c0_i32, %c0_i32_0 : i32, i32
  }
  func.func @transform_4(%arg0: i32) -> (i32, i32) {
    %c0_i32 = arith.constant 0 : i32
    %c0_i32_0 = arith.constant 0 : i32
    %c0_i32_1 = arith.constant 0 : i32
    return %c0_i32, %c0_i32_0 : i32, i32
  }
  func.func @transform_5(%arg0: i32) -> (i32, i32) {
    %c0_i32 = arith.constant 0 : i32
    %c0_i32_0 = arith.constant 0 : i32
    %c0_i32_1 = arith.constant 0 : i32
    return %c0_i32, %c0_i32_0 : i32, i32
  }
  func.func @transform_6(%arg0: i32) -> (i32, i32) {
    %c0_i32 = arith.constant 0 : i32
    %c0_i32_0 = arith.constant 0 : i32
    %c0_i32_1 = arith.constant 0 : i32
    return %c0_i32, %c0_i32_0 : i32, i32
  }
  func.func @transform_7(%arg0: i32) -> (i32, i32) {
    %c0_i32 = arith.constant 0 : i32
    %c0_i32_0 = arith.constant 0 : i32
    return %arg0, %c0_i32 : i32, i32
  }
}

</mosaic_0001>

<bundles_post_ra>
// kernel: tpu_custom_call.1
= control target key start
LH: loop header
LB: loop body
LE: loop exit
PB: predicated region body
PF: predicated region fallthrough
CT: control target
= control target key end

     0   :  { %12 = vsyncpa [#allocation3], 0  ;;  %s2180_s0 = inlined_call_operand.hbm [shape: bf16[16,896], index: 0, kind: input, shape index: {}]   ;;  %s2181_s1 = inlined_call_operand.hbm [shape: bf16[896,256], index: 1, kind: input, shape index: {}]   ;;  %s2182_s2 = inlined_call_operand.vmem [shape: f32[1,256], index: 2, kind: input, shape index: {}]   ;;  %s2183_s3 = inlined_call_operand.hbm [shape: bf16[256,256], index: 3, kind: input, shape index: {}]   ;;  %s2184_s4 = inlined_call_operand.vmem [shape: f32[1,256], index: 4, kind: input, shape index: {}]   ;;  %s2185_s5 = inlined_call_operand.hbm [shape: bf16[256,128], index: 5, kind: input, shape index: {}]   ;;  %s2186_s6 = inlined_call_operand.vmem [shape: f32[1,128], index: 6, kind: input, shape index: {}]   ;;  %s2187_s7 = inlined_call_operand.hbm [shape: f32[16,128], index: 7, kind: output, shape index: {}]  }
   0x1   :  { %13 = vsyncpa [#allocation6], 0 }
   0x2   :  { %14 = vsyncpa [#allocation9], 0 }
   0x3   :  { %15 = vsyncpa [#allocation4], 0  ;;  %s2043_s24 = smov [#allocation5]   ;;  %s1925_s28 = scalar_lea.hbm %s2181_s1, 14336 }
   0x4   :  { %s33_s25 = sshll.u32 %s2043_s24, 4  ;;  %p1926_p0 = scmp.ne.s32.totalorder %s2181_s1, %s1925_s28  ;;  %s34_s25 = int_to_ptr.vmem [resolvable:$true] %s33_s25 }
   0x5   :  { %p1929_p1 = scmp.lt.u32.totalorder %s1925_s28, %s2181_s1 }
   0x7   :  { %p1931_p2 = pnand %p1929_p1, %p1926_p0 }
   0x9   :  { %1934 = shalt.err (!%p1931_p2)
}
   0xa   :  { %s1935_s10 = scalar_lea.vmem %s34_s25, 14336  ;;  %p1940_p4 = scmp.lt.s32.totalorder %s34_s25, %s34_s25 }
   0xb   :  { %p1936_p3 = scmp.ne.s32.totalorder %s34_s25, %s1935_s10  ;;  %p1941_p5 = scmp.lt.s32.totalorder %s1935_s10, %s1935_s10 }
   0xd   :  { %p1942_p6 = por %p1941_p5, %p1940_p4 }
   0xf   :  { %p1943_p7 = pnand %p1942_p6, %p1936_p3 }
  0x11   :  { %1946 = shalt.err (!%p1943_p7)
}
  0x12   :  { %s2044_s11 = smov 128   ;;  %s2045_s12 = smov 8  }
  0x13   :  { %39 = dma.hbm_to_vmem [thread:$0]  %s2181_s1, 14336, %s34_s25, [#allocation6], %s2044_s11, %s2044_s11, %s2045_s12  }
  0x14   :  { %s2046_s15 = smov [#allocation2]   ;;  %s1947_s19 = scalar_lea.hbm %s2180_s0, 896 }
  0x15   :  { %s21_s16 = sshll.u32 %s2046_s15, 4  ;;  %p1948_p8 = scmp.ne.s32.totalorder %s2180_s0, %s1947_s19  ;;  %s22_s16 = int_to_ptr.vmem [resolvable:$true] %s21_s16 }
  0x16   :  { %p1951_p9 = scmp.lt.u32.totalorder %s1947_s19, %s2180_s0 }
  0x18   :  { %p1953_p10 = pnand %p1951_p9, %p1948_p8 }
  0x1a   :  { %1956 = shalt.err (!%p1953_p10)
}
  0x1b   :  { %s1957_s24 = scalar_lea.vmem %s22_s16, 896  ;;  %p1962_p12 = scmp.lt.s32.totalorder %s22_s16, %s22_s16 }
  0x1c   :  { %p1958_p11 = scmp.ne.s32.totalorder %s22_s16, %s1957_s24  ;;  %p1963_p13 = scmp.lt.s32.totalorder %s1957_s24, %s1957_s24 }
  0x1e   :  { %p1964_p0 = por %p1963_p13, %p1962_p12 }
  0x20   :  { %p1965_p1 = pnand %p1964_p0, %p1958_p11 }
  0x22   :  { %1968 = shalt.err (!%p1965_p1)
}
  0x23   :  { %s2047_s1 = smov 448   ;;  %s2048_s25 = smov 28  }
  0x24   :  { %27 = dma.hbm_to_vmem [thread:$0]  %s2180_s0, 896, %s22_s16, [#allocation3], %s2047_s1, %s2047_s1, %s2048_s25  }
  0x25   :  { %s2049_s28 = smov [#allocation7]   ;;  %s2050_s30 = smov [#allocation8]  }
  0x26   :  { %s47_s29 = sshll.u32 %s2049_s28, 4  ;;  %s61_s8 = sshll.u32 %s2050_s30, 4  ;;  %s48_s29 = int_to_ptr.vmem [resolvable:$true] %s47_s29  ;;  %s2122_s8 = int_to_ptr.vmem [resolvable:$true] %s61_s8 }
  0x27   :  { %s1969_s13 = scalar_lea.hbm %s2183_s3, 4096 }
  0x28   :  { %p1970_p2 = scmp.ne.s32.totalorder %s2183_s3, %s1969_s13  ;;  %p1973_p3 = scmp.lt.u32.totalorder %s1969_s13, %s2183_s3 }
  0x2a   :  { %p1975_p4 = pnand %p1973_p3, %p1970_p2 }
  0x2c   :  { %1978 = shalt.err (!%p1975_p4)
}
  0x2d   :  { %s1979_s0 = scalar_lea.vmem %s48_s29, 4096  ;;  %p1984_p6 = scmp.lt.s32.totalorder %s48_s29, %s48_s29 }
  0x2e   :  { %p1980_p5 = scmp.ne.s32.totalorder %s48_s29, %s1979_s0  ;;  %p1985_p7 = scmp.lt.s32.totalorder %s1979_s0, %s1979_s0 }
  0x30   :  { %p1986_p8 = por %p1985_p7, %p1984_p6 }
  0x32   :  { %p1987_p9 = pnand %p1986_p8, %p1980_p5 }
  0x34   :  { %1990 = shalt.err (!%p1987_p9)
}
  0x35   :  { %53 = dma.hbm_to_vmem [thread:$0]  %s2183_s3, 4096, %s48_s29, [#allocation6], %s2044_s11, %s2044_s11, %s2045_s12  }
  0x36   :  { %s1991_s22 = scalar_lea.hbm %s2185_s5, 2048 }
  0x37   :  { %p1992_p10 = scmp.ne.s32.totalorder %s2185_s5, %s1991_s22  ;;  %p1995_p11 = scmp.lt.u32.totalorder %s1991_s22, %s2185_s5 }
  0x39   :  { %p1997_p12 = pnand %p1995_p11, %p1992_p10 }
  0x3b   :  { %2000 = shalt.err (!%p1997_p12)
}
  0x3c   :  { %s2001_s26 = scalar_lea.vmem %s2122_s8, 2048  ;;  %p2006_p0 = scmp.lt.s32.totalorder %s2122_s8, %s2122_s8 }
  0x3d   :  { %p2002_p13 = scmp.ne.s32.totalorder %s2122_s8, %s2001_s26  ;;  %p2007_p1 = scmp.lt.s32.totalorder %s2001_s26, %s2001_s26 }
  0x3f   :  { %p2008_p2 = por %p2007_p1, %p2006_p0 }
  0x41   :  { %p2009_p3 = pnand %p2008_p2, %p2002_p13 }
  0x43   :  { %2012 = shalt.err (!%p2009_p3)
}
  0x44   :  { %s2051_s3 = smov 64   ;;  %s2052_s27 = smov 4  }
  0x45   :  { %67 = dma.hbm_to_vmem [thread:$0]  %s2185_s5, 2048, %s2122_s8, [#allocation9], %s2051_s3, %s2051_s3, %s2052_s27  }
  0x46   :  { %2035 = dma.done.wait [#allocation3], 896  }
  0x47   :  { %2036 = vsyncadd [#allocation3], 4294966400 }
  0x48   :  { %2037 = dma.done.wait [#allocation6], 18432  }
  0x49   :  { %2038 = vsyncadd [#allocation6], 4294948864 }
  0x4a   :  { %2039 = dma.done.wait [#allocation9], 2048  }
  0x4b   :  { %2040 = vsyncadd [#allocation9], 4294965248  ;;  %v1675_v0 = vld [vmem:[#allocation5 + $0x104] ss:$8 sps:$4 sm:$0xff]   ;;  %v1677_v1 = vld [vmem:[#allocation5 + $0x100] ss:$8 sps:$4 sm:$0xff]  }
  0x4c   :  { %854 = vmatprep.subr.bf16.mxu0 %v1675_v0  ;;  %v1678_v2 = vld [vmem:[#allocation5 + $0x114] ss:$8 sps:$4 sm:$0xff]   ;;  %v1680_v3 = vld [vmem:[#allocation5 + $0x110] ss:$8 sps:$4 sm:$0xff]   ;;  %v1681_v4 = vld [vmem:[#allocation5 + $0x124] ss:$8 sps:$4 sm:$0xff]  }
  0x4d   :  { %855 = vmatpush1.bf16.msra.mxu0 %v1677_v1  ;;  %v1683_v5 = vld [vmem:[#allocation5 + $0x120] ss:$8 sps:$4 sm:$0xff]   ;;  %v1684_v6 = vld [vmem:[#allocation5 + $0x134] ss:$8 sps:$4 sm:$0xff]   ;;  %v1686_v7 = vld [vmem:[#allocation5 + $0x130] ss:$8 sps:$4 sm:$0xff]  }
  0x4e   :  { %856 = vmatprep.subr.bf16.mxu0 %v1678_v2  ;;  %v1687_v8 = vld [vmem:[#allocation5 + $0x144] ss:$8 sps:$4 sm:$0xff]   ;;  %v1689_v9 = vld [vmem:[#allocation5 + $0x140] ss:$8 sps:$4 sm:$0xff]   ;;  %v1690_v10 = vld [vmem:[#allocation5 + $0x154] ss:$8 sps:$4 sm:$0xff]  }
  0x4f   :  { %v1692_v11 = vld [vmem:[#allocation5 + $0x150] ss:$8 sps:$4 sm:$0xff]   ;;  %v1693_v12 = vld [vmem:[#allocation5 + $0x164] ss:$8 sps:$4 sm:$0xff]   ;;  %v1695_v14 = vld [vmem:[#allocation5 + $0x160] ss:$8 sps:$4 sm:$0xff]  }
  0x50   :  { %v1725_v13 = vld [vmem:[#allocation2 + $0xc] ss:$28 sps:$4 sm:$0xff]   ;;  %v1699_v17 = vld [vmem:[#allocation5 + $0x184] ss:$8 sps:$4 sm:$0xff]   ;;  %v1701_v18 = vld [vmem:[#allocation5 + $0x180] ss:$8 sps:$4 sm:$0xff]  }
  0x51   :  { %857 = vmatpush1.bf16.msra.mxu0 %v1680_v3  ;;  %v1696_v15 = vld [vmem:[#allocation5 + $0x174] ss:$8 sps:$4 sm:$0xff]   ;;  %886 = vmatprep.mubr.bf16.mxu0 %v1725_v13  ;;  %v1698_v16 = vld [vmem:[#allocation5 + $0x170] ss:$8 sps:$4 sm:$0xff]   ;;  %v1747_v20 = vld [vmem:[#allocation5 + $0x4] ss:$8 sps:$4 sm:$0xff]  }
  0x52   :  { %858 = vmatprep.subr.bf16.mxu0 %v1681_v4  ;;  %v1702_v19 = vld [vmem:[#allocation5 + $0x194] ss:$8 sps:$4 sm:$0xff]   ;;  %v1749_v21 = vld [vmem:[#allocation5] ss:$8 sps:$4 sm:$0xff]   ;;  %v1704_v22 = vld [vmem:[#allocation5 + $0x190] ss:$8 sps:$4 sm:$0xff]   ;;  %811 = vmatprep.subr.bf16.mxu1 %v1747_v20 }
  0x53   :  { %812 = vmatpush1.bf16.msra.mxu1 %v1749_v21  ;;  %v1753_v23 = vld [vmem:[#allocation5 + $0x14] ss:$8 sps:$4 sm:$0xff]   ;;  %v1755_v24 = vld [vmem:[#allocation5 + $0x10] ss:$8 sps:$4 sm:$0xff]   ;;  %v1705_v25 = vld [vmem:[#allocation5 + $0x1a4] ss:$8 sps:$4 sm:$0xff]  }
  0x54   :  { %813 = vmatprep.subr.bf16.mxu1 %v1753_v23  ;;  %v1707_v26 = vld [vmem:[#allocation5 + $0x1a0] ss:$8 sps:$4 sm:$0xff]   ;;  %v1759_v27 = vld [vmem:[#allocation5 + $0x24] ss:$8 sps:$4 sm:$0xff]   ;;  %v1708_v28 = vld [vmem:[#allocation5 + $0x1b4] ss:$8 sps:$4 sm:$0xff]  }
  0x55   :  { %859 = vmatpush1.bf16.msra.mxu0 %v1683_v5  ;;  %v1761_v29 = vld [vmem:[#allocation5 + $0x20] ss:$8 sps:$4 sm:$0xff]   ;;  %v1765_v30 = vld [vmem:[#allocation5 + $0x34] ss:$8 sps:$4 sm:$0xff]   ;;  %v1710_v31 = vld [vmem:[#allocation5 + $0x1b0] ss:$8 sps:$4 sm:$0xff]  }
  0x56   :  { %860 = vmatprep.subr.bf16.mxu0 %v1684_v6  ;;  %v1711_v32 = vld [vmem:[#allocation5 + $0x1c4] ss:$8 sps:$4 sm:$0xff]   ;;  %v1767_v33 = vld [vmem:[#allocation5 + $0x30] ss:$8 sps:$4 sm:$0xff]   ;;  %v1713_v35 = vld [vmem:[#allocation5 + $0x1c0] ss:$8 sps:$4 sm:$0xff]  }
  0x57   :  { %814 = vmatpush1.bf16.msra.mxu1 %v1755_v24  ;;  %v1771_v34 = vld [vmem:[#allocation5 + $0x44] ss:$8 sps:$4 sm:$0xff]   ;;  %v1714_v36 = vld [vmem:[#allocation5 + $0x1d4] ss:$8 sps:$4 sm:$0xff]   ;;  %v1773_v37 = vld [vmem:[#allocation5 + $0x40] ss:$8 sps:$4 sm:$0xff]  }
  0x58   :  { %815 = vmatprep.subr.bf16.mxu1 %v1759_v27  ;;  %v1777_v38 = vld [vmem:[#allocation5 + $0x54] ss:$8 sps:$4 sm:$0xff]   ;;  %v1716_v39 = vld [vmem:[#allocation5 + $0x1d0] ss:$8 sps:$4 sm:$0xff]   ;;  %v1717_v40 = vld [vmem:[#allocation5 + $0x1e4] ss:$8 sps:$4 sm:$0xff]  }
  0x59   :  { %861 = vmatpush1.bf16.msra.mxu0 %v1686_v7  ;;  %v1779_v41 = vld [vmem:[#allocation5 + $0x50] ss:$8 sps:$4 sm:$0xff]   ;;  %v1783_v42 = vld [vmem:[#allocation5 + $0x64] ss:$8 sps:$4 sm:$0xff]   ;;  %v1719_v43 = vld [vmem:[#allocation5 + $0x1e0] ss:$8 sps:$4 sm:$0xff]  }
  0x5a   :  { %862 = vmatprep.subr.bf16.mxu0 %v1687_v8  ;;  %v1720_v44 = vld [vmem:[#allocation5 + $0x1f4] ss:$8 sps:$4 sm:$0xff]   ;;  %v1785_v45 = vld [vmem:[#allocation5 + $0x60] ss:$8 sps:$4 sm:$0xff]   ;;  %v1722_v47 = vld [vmem:[#allocation5 + $0x1f0] ss:$8 sps:$4 sm:$0xff]  }
  0x5b   :  { %816 = vmatpush1.bf16.msra.mxu1 %v1761_v29  ;;  %v1789_v46 = vld [vmem:[#allocation5 + $0x74] ss:$8 sps:$4 sm:$0xff]   ;;  %v1728_v48 = vld [vmem:[#allocation5 + $0x204] ss:$8 sps:$4 sm:$0xff]   ;;  %v1791_v49 = vld [vmem:[#allocation5 + $0x70] ss:$8 sps:$4 sm:$0xff]  }
  0x5c   :  { %817 = vmatprep.subr.bf16.mxu1 %v1765_v30  ;;  %v1795_v50 = vld [vmem:[#allocation5 + $0x84] ss:$8 sps:$4 sm:$0xff]   ;;  %v1726_v52 = vld [vmem:[#allocation5 + $0x200] ss:$8 sps:$4 sm:$0xff]   ;;  %v1731_v53 = vld [vmem:[#allocation5 + $0x214] ss:$8 sps:$4 sm:$0xff]  }
  0x5d   :  { %863 = vmatpush1.bf16.msra.mxu0 %v1689_v9  ;;  %v1723_v51 = vld [vmem:[#allocation2 + $0x8] ss:$28 sps:$4 sm:$0xff]   ;;  %v1797_v54 = vld [vmem:[#allocation5 + $0x80] ss:$8 sps:$4 sm:$0xff]   ;;  %v1801_v55 = vld [vmem:[#allocation5 + $0x94] ss:$8 sps:$4 sm:$0xff]  }
  0x5e   :  { %864 = vmatprep.subr.bf16.mxu0 %v1690_v10  ;;  %v1806_v56 = vld [vmem:[#allocation2 + $0x14] ss:$28 sps:$4 sm:$0xff]   ;;  %v1734_v58 = vld [vmem:[#allocation5 + $0x224] ss:$8 sps:$4 sm:$0xff]   ;;  %v1732_v61 = vld [vmem:[#allocation5 + $0x220] ss:$8 sps:$4 sm:$0xff]  }
  0x5f   :  { %818 = vmatpush1.bf16.msra.mxu1 %v1767_v33  ;;  %v1729_v57 = vld [vmem:[#allocation5 + $0x210] ss:$8 sps:$4 sm:$0xff]   ;;  %v1810_v60 = vld [vmem:[#allocation5 + $0xa4] ss:$8 sps:$4 sm:$0xff]   ;;  %v1737_v62 = vld [vmem:[#allocation5 + $0x234] ss:$8 sps:$4 sm:$0xff]  }
  0x60   :  { %819 = vmatprep.subr.bf16.mxu1 %v1771_v34  ;;  %v1803_v59 = vld [vmem:[#allocation5 + $0x90] ss:$8 sps:$4 sm:$0xff]   ;;  %v1812_v63 = vld [vmem:[#allocation5 + $0xa0] ss:$8 sps:$4 sm:$0xff]   ;;  %v1816_v0 = vld [vmem:[#allocation5 + $0xb4] ss:$8 sps:$4 sm:$0xff]  }
  0x61   :  { %865 = vmatpush1.bf16.msra.mxu0 %v1692_v11  ;;  %v1735_v1 = vld [vmem:[#allocation5 + $0x230] ss:$8 sps:$4 sm:$0xff]   ;;  %v1740_v2 = vld [vmem:[#allocation5 + $0x244] ss:$8 sps:$4 sm:$0xff]   ;;  %v1738_v6 = vld [vmem:[#allocation5 + $0x240] ss:$8 sps:$4 sm:$0xff]  }
  0x62   :  { %866 = vmatprep.subr.bf16.mxu0 %v1693_v12  ;;  %v1818_v3 = vld [vmem:[#allocation5 + $0xb0] ss:$8 sps:$4 sm:$0xff]   ;;  %v1822_v4 = vld [vmem:[#allocation5 + $0xc4] ss:$8 sps:$4 sm:$0xff]   ;;  %v1824_v7 = vld [vmem:[#allocation5 + $0xc0] ss:$8 sps:$4 sm:$0xff]  }
  0x63   :  { %820 = vmatpush1.bf16.msra.mxu1 %v1773_v37  ;;  %v1848_v5 = vld [vmem:[#allocation2 + $0x4] ss:$28 sps:$4 sm:$0xff]   ;;  %v1743_v8 = vld [vmem:[#allocation5 + $0x254] ss:$8 sps:$4 sm:$0xff]   ;;  %v1741_v10 = vld [vmem:[#allocation5 + $0x250] ss:$8 sps:$4 sm:$0xff]  }
  0x64   :  { %821 = vmatprep.subr.bf16.mxu1 %v1777_v38  ;;  %v1828_v9 = vld [vmem:[#allocation5 + $0xd4] ss:$8 sps:$4 sm:$0xff]   ;;  %843 = vmatprep.mubr.bf16.mxu1 %v1848_v5  ;;  %v1830_v11 = vld [vmem:[#allocation5 + $0xd0] ss:$8 sps:$4 sm:$0xff]   ;;  %v1746_v12 = vld [vmem:[#allocation5 + $0x264] ss:$8 sps:$4 sm:$0xff]  }
  0x65   :  { %867 = vmatpush1.bf16.msra.mxu0 %v1695_v14  ;;  %v1834_v13 = vld [vmem:[#allocation5 + $0xe4] ss:$8 sps:$4 sm:$0xff]   ;;  %v1744_v14 = vld [vmem:[#allocation5 + $0x260] ss:$8 sps:$4 sm:$0xff]   ;;  %v1764_v24 = vld [vmem:[#allocation5 + $0x294] ss:$8 sps:$4 sm:$0xff]  }
  0x66   :  { %868 = vmatprep.subr.bf16.mxu0 %v1696_v15  ;;  %v1836_v15 = vld [vmem:[#allocation5 + $0xe0] ss:$8 sps:$4 sm:$0xff]   ;;  %v1758_v20 = vld [vmem:[#allocation5 + $0x284] ss:$8 sps:$4 sm:$0xff]   ;;  %v1762_v27 = vld [vmem:[#allocation5 + $0x290] ss:$8 sps:$4 sm:$0xff]  }
  0x67   :  { %822 = vmatpush1.bf16.msra.mxu1 %v1779_v41  ;;  %v1855_v21 = vld [vmem:[#allocation7 + $0x4] ss:$8 sps:$4 sm:$0xff]   ;;  %v1776_v33 = vld [vmem:[#allocation5 + $0x2b4] ss:$8 sps:$4 sm:$0xff]   ;;  %v1825_v5 = vld [vmem:[#allocation5 + $0x330] ss:$8 sps:$4 sm:$0xff]  }
  0x68   :  { %823 = vmatprep.subr.bf16.mxu1 %v1783_v42  ;;  %v1846_v23 = vld [vmem:[#allocation2] ss:$28 sps:$4 sm:$0xff]   ;;  %v1864_v34 = vld [vmem:[#allocation7 + $0x34] ss:$8 sps:$4 sm:$0xff]  }
  0x69   :  { %869 = vmatpush1.bf16.msra.mxu0 %v1698_v16  ;;  %v1752_v16 = vld [vmem:[#allocation5 + $0x274] ss:$8 sps:$4 sm:$0xff]   ;;  %v1770_v29 = vld [vmem:[#allocation5 + $0x2a4] ss:$8 sps:$4 sm:$0xff]  }
  0x6a   :  { %870 = vmatprep.subr.bf16.mxu0 %v1699_v17  ;;  %v1840_v17 = vld [vmem:[#allocation5 + $0xf4] ss:$8 sps:$4 sm:$0xff]   ;;  %v1861_v30 = vld [vmem:[#allocation7 + $0x24] ss:$8 sps:$4 sm:$0xff]  }
  0x6b   :  { %824 = vmatpush1.bf16.msra.mxu1 %v1785_v45  ;;  %v1782_v37 = vld [vmem:[#allocation5 + $0x2c4] ss:$8 sps:$4 sm:$0xff]   ;;  %v1788_v41 = vld [vmem:[#allocation5 + $0x2d4] ss:$8 sps:$4 sm:$0xff]  }
  0x6c   :  { %825 = vmatprep.subr.bf16.mxu1 %v1789_v46  ;;  %v1867_v38 = vld [vmem:[#allocation7 + $0x44] ss:$8 sps:$4 sm:$0xff]   ;;  %v1870_v42 = vld [vmem:[#allocation7 + $0x54] ss:$8 sps:$4 sm:$0xff]  }
  0x6d   :  { %871 = vmatpush1.bf16.msra.mxu0 %v1701_v18  ;;  %v1750_v18 = vld [vmem:[#allocation5 + $0x270] ss:$8 sps:$4 sm:$0xff]   ;;  %v1794_v45 = vld [vmem:[#allocation5 + $0x2e4] ss:$8 sps:$4 sm:$0xff]  }
  0x6e   :  { %872 = vmatprep.subr.bf16.mxu0 %v1702_v19  ;;  %v1842_v19 = vld [vmem:[#allocation5 + $0xf0] ss:$8 sps:$4 sm:$0xff]   ;;  %v1873_v46 = vld [vmem:[#allocation7 + $0x64] ss:$8 sps:$4 sm:$0xff]  }
  0x6f   :  { %826 = vmatpush1.bf16.msra.mxu1 %v1791_v49  ;;  %v1800_v49 = vld [vmem:[#allocation5 + $0x2f4] ss:$8 sps:$4 sm:$0xff]  }
  0x70   :  { %827 = vmatprep.subr.bf16.mxu1 %v1795_v50  ;;  %v1876_v50 = vld [vmem:[#allocation7 + $0x74] ss:$8 sps:$4 sm:$0xff]  }
  0x71   :  { %873 = vmatpush1.bf16.msra.mxu0 %v1704_v22  ;;  %v1756_v22 = vld [vmem:[#allocation5 + $0x280] ss:$8 sps:$4 sm:$0xff]  }
  0x72   :  { %874 = vmatprep.subr.bf16.mxu0 %v1705_v25  ;;  %v1853_v25 = vld [vmem:[#allocation7] ss:$8 sps:$4 sm:$0xff]  }
  0x73   :  { %828 = vmatpush1.bf16.msra.mxu1 %v1797_v54  ;;  %v1879_v54 = vld [vmem:[#allocation7 + $0x84] ss:$8 sps:$4 sm:$0xff]  }
  0x74   :  { %829 = vmatprep.subr.bf16.mxu1 %v1801_v55  ;;  %v1804_v55 = vld [vmem:[#allocation2 + $0x10] ss:$28 sps:$4 sm:$0xff]  }
  0x75   :  { %875 = vmatpush1.bf16.msra.mxu0 %v1707_v26  ;;  %v1858_v26 = vld [vmem:[#allocation7 + $0x14] ss:$8 sps:$4 sm:$0xff]  }
  0x76   :  { %876 = vmatprep.subr.bf16.mxu0 %v1708_v28  ;;  %v1856_v28 = vld [vmem:[#allocation7 + $0x10] ss:$8 sps:$4 sm:$0xff]  }
  0x77   :  { %830 = vmatpush1.bf16.msra.mxu1 %v1803_v59  ;;  %v1882_v59 = vld [vmem:[#allocation7 + $0x94] ss:$8 sps:$4 sm:$0xff]  }
  0x78   :  { %831 = vmatprep.subr.bf16.mxu1 %v1810_v60  ;;  %v1813_v60 = vld [vmem:[#allocation5 + $0x310] ss:$8 sps:$4 sm:$0xff]  }
  0x79   :  { %877 = vmatpush1.bf16.msra.mxu0 %v1710_v31  ;;  %v1768_v31 = vld [vmem:[#allocation5 + $0x2a0] ss:$8 sps:$4 sm:$0xff]  }
  0x7a   :  { %878 = vmatprep.subr.bf16.mxu0 %v1711_v32  ;;  %v1859_v32 = vld [vmem:[#allocation7 + $0x20] ss:$8 sps:$4 sm:$0xff]  }
  0x7b   :  { %832 = vmatpush1.bf16.msra.mxu1 %v1812_v63  ;;  %v1880_v63 = vld [vmem:[#allocation7 + $0x90] ss:$8 sps:$4 sm:$0xff]  }
  0x7c   :  { %833 = vmatprep.subr.bf16.mxu1 %v1816_v0  ;;  %v1885_v0 = vld [vmem:[#allocation7 + $0xa4] ss:$8 sps:$4 sm:$0xff]  }
  0x7d   :  { %879 = vmatpush1.bf16.msra.mxu0 %v1713_v35  ;;  %v1774_v35 = vld [vmem:[#allocation5 + $0x2b0] ss:$8 sps:$4 sm:$0xff]  }
  0x7e   :  { %880 = vmatprep.subr.bf16.mxu0 %v1714_v36  ;;  %v1862_v36 = vld [vmem:[#allocation7 + $0x30] ss:$8 sps:$4 sm:$0xff]  }
  0x7f   :  { %834 = vmatpush1.bf16.msra.mxu1 %v1818_v3  ;;  %v1883_v3 = vld [vmem:[#allocation7 + $0xa0] ss:$8 sps:$4 sm:$0xff]  }
  0x80   :  { %835 = vmatprep.subr.bf16.mxu1 %v1822_v4  ;;  %v1888_v4 = vld [vmem:[#allocation7 + $0xb4] ss:$8 sps:$4 sm:$0xff]  }
  0x81   :  { %881 = vmatpush1.bf16.msra.mxu0 %v1716_v39  ;;  %v1780_v39 = vld [vmem:[#allocation5 + $0x2c0] ss:$8 sps:$4 sm:$0xff]  }
  0x82   :  { %882 = vmatprep.subr.bf16.mxu0 %v1717_v40  ;;  %v1865_v40 = vld [vmem:[#allocation7 + $0x40] ss:$8 sps:$4 sm:$0xff]  }
  0x83   :  { %836 = vmatpush1.bf16.msra.mxu1 %v1824_v7  ;;  %v1886_v7 = vld [vmem:[#allocation7 + $0xb0] ss:$8 sps:$4 sm:$0xff]  }
  0x84   :  { %837 = vmatprep.subr.bf16.mxu1 %v1828_v9  ;;  %v1839_v9 = vld [vmem:[#allocation5 + $0x354] ss:$8 sps:$4 sm:$0xff]  }
  0x85   :  { %883 = vmatpush1.bf16.msra.mxu0 %v1719_v43  ;;  %v1786_v43 = vld [vmem:[#allocation5 + $0x2d0] ss:$8 sps:$4 sm:$0xff]  }
  0x86   :  { %884 = vmatprep.subr.bf16.mxu0 %v1720_v44  ;;  %v1868_v44 = vld [vmem:[#allocation7 + $0x50] ss:$8 sps:$4 sm:$0xff]  }
  0x87   :  { %838 = vmatpush1.bf16.msra.mxu1 %v1830_v11  ;;  %v1845_v11 = vld [vmem:[#allocation5 + $0x364] ss:$8 sps:$4 sm:$0xff]  }
  0x88   :  { %839 = vmatprep.subr.bf16.mxu1 %v1834_v13  ;;  %v1851_v13 = vld [vmem:[#allocation5 + $0x374] ss:$8 sps:$4 sm:$0xff]  }
  0x89   :  { %885 = vmatpush1.bf16.msra.mxu0 %v1722_v47  ;;  %v1792_v47 = vld [vmem:[#allocation5 + $0x2e0] ss:$8 sps:$4 sm:$0xff]  }
  0x8a   :  { %897 = vmatprep.subr.bf16.mxu0 %v1728_v48  ;;  %v1871_v48 = vld [vmem:[#allocation7 + $0x60] ss:$8 sps:$4 sm:$0xff]  }
  0x8b   :  { %840 = vmatpush1.bf16.msra.mxu1 %v1836_v15  ;;  %v1852_v15 = vld [vmem:[#allocation2 + $0x18] ss:$28 sps:$4 sm:$0xff]  }
  0x8c   :  { %887 = vmatmul.mubr.bf16.vlgmr.msra.gmra.mrb[0].mxu0 %v1723_v51  ;;  %841 = vmatprep.subr.bf16.mxu1 %v1840_v17  ;;  %v1798_v51 = vld [vmem:[#allocation5 + $0x2f0] ss:$8 sps:$4 sm:$0xff]   ;;  %v1891_v17 = vld [vmem:[#allocation7 + $0xc4] ss:$8 sps:$4 sm:$0xff]  }
  0x8d   :  { %898 = vmatpush1.bf16.msra.mxu0 %v1726_v52  ;;  %929 = vmatprep.mubr.bf16.mxu0 %v1806_v56  ;;  %v1874_v52 = vld [vmem:[#allocation7 + $0x70] ss:$8 sps:$4 sm:$0xff]   ;;  %v1807_v56 = vld [vmem:[#allocation5 + $0x300] ss:$8 sps:$4 sm:$0xff]  }
  0x8e   :  { %899 = vmatprep.subr.bf16.mxu0 %v1731_v53  ;;  %v1809_v53 = vld [vmem:[#allocation5 + $0x304] ss:$8 sps:$4 sm:$0xff]  }
  0x8f   :  { %842 = vmatpush1.bf16.msra.mxu1 %v1842_v19  ;;  %v1894_v19 = vld [vmem:[#allocation7 + $0xd4] ss:$8 sps:$4 sm:$0xff]  }
  0x90   :  { %1193 = vmatprep.subr.bf16.mxu1 %v1855_v21  ;;  %v1895_v21 = vld [vmem:[#allocation7 + $0xe0] ss:$8 sps:$4 sm:$0xff]  }
  0x91   :  { %900 = vmatpush1.bf16.msra.mxu0 %v1729_v57  ;;  %v1815_v57 = vld [vmem:[#allocation5 + $0x314] ss:$8 sps:$4 sm:$0xff]  }
  0x92   :  { %901 = vmatprep.subr.bf16.mxu0 %v1734_v58  ;;  %844 = vmatmul.mubr.bf16.vlgmr.msra.gmra.mrb[0].mxu1 %v1846_v23  ;;  %v1877_v58 = vld [vmem:[#allocation7 + $0x80] ss:$8 sps:$4 sm:$0xff]   ;;  %v1898_v23 = vld [vmem:[#allocation7 + $0xf0] ss:$8 sps:$4 sm:$0xff]  }
  0x93   :  { %1194 = vmatpush1.bf16.msra.mxu1 %v1853_v25 }
  0x94   :  { %1195 = vmatprep.subr.bf16.mxu1 %v1858_v26 }
  0x95   :  { %902 = vmatpush1.bf16.msra.mxu0 %v1732_v61  ;;  %v2053_v61 = vmov 0  }
  0x96   :  { %903 = vmatprep.subr.bf16.mxu0 %v1737_v62  ;;  %v1821_v62 = vld [vmem:[#allocation5 + $0x324] ss:$8 sps:$4 sm:$0xff]  }
  0x97   :  { %1196 = vmatpush1.bf16.msra.mxu1 %v1856_v28 }
  0x98   :  { %1197 = vmatprep.subr.bf16.mxu1 %v1861_v30 }
  0x99   :  { %904 = vmatpush1.bf16.msra.mxu0 %v1735_v1  ;;  %v1819_v1 = vld [vmem:[#allocation5 + $0x320] ss:$8 sps:$4 sm:$0xff]  }
  0x9a   :  { %905 = vmatprep.subr.bf16.mxu0 %v1740_v2  ;;  %v1827_v2 = vld [vmem:[#allocation5 + $0x334] ss:$8 sps:$4 sm:$0xff]  }
  0x9b   :  { %1198 = vmatpush1.bf16.msra.mxu1 %v1859_v32  ;;  %v203_v32 = vld [vmem:[%s2182_s2] sm:$0x3] }
  0x9c   :  { %1199 = vmatprep.subr.bf16.mxu1 %v1864_v34 }
  0x9d   :  { %906 = vmatpush1.bf16.msra.mxu0 %v1738_v6  ;;  %v1833_v6 = vld [vmem:[#allocation5 + $0x344] ss:$8 sps:$4 sm:$0xff]  }
  0x9e   :  { %907 = vmatprep.subr.bf16.mxu0 %v1743_v8  ;;  %v1831_v8 = vld [vmem:[#allocation5 + $0x340] ss:$8 sps:$4 sm:$0xff]  }
  0x9f   :  { %1200 = vmatpush1.bf16.msra.mxu1 %v1862_v36 }
  0xa0   :  { %1201 = vmatprep.subr.bf16.mxu1 %v1867_v38 }
  0xa1   :  { %908 = vmatpush1.bf16.msra.mxu0 %v1741_v10  ;;  %v1837_v10 = vld [vmem:[#allocation5 + $0x350] ss:$8 sps:$4 sm:$0xff]  }
  0xa2   :  { %909 = vmatprep.subr.bf16.mxu0 %v1746_v12  ;;  %v1843_v12 = vld [vmem:[#allocation5 + $0x360] ss:$8 sps:$4 sm:$0xff]  }
  0xa3   :  { %1202 = vmatpush1.bf16.msra.mxu1 %v1865_v40 }
  0xa4   :  { %1203 = vmatprep.subr.bf16.mxu1 %v1870_v42 }
  0xa5   :  { %910 = vmatpush1.bf16.msra.mxu0 %v1744_v14  ;;  %v1849_v14 = vld [vmem:[#allocation5 + $0x370] ss:$8 sps:$4 sm:$0xff]  }
  0xa6   :  { %911 = vmatprep.subr.bf16.mxu0 %v1752_v16  ;;  %v1889_v16 = vld [vmem:[#allocation7 + $0xc0] ss:$8 sps:$4 sm:$0xff]  }
  0xa7   :  { %1204 = vmatpush1.bf16.msra.mxu1 %v1868_v44 }
  0xa8   :  { %1205 = vmatprep.subr.bf16.mxu1 %v1873_v46 }
  0xa9   :  { %912 = vmatpush1.bf16.msra.mxu0 %v1750_v18  ;;  %v1892_v18 = vld [vmem:[#allocation7 + $0xd0] ss:$8 sps:$4 sm:$0xff]  }
  0xaa   :  { %913 = vmatprep.subr.bf16.mxu0 %v1758_v20  ;;  %v1897_v20 = vld [vmem:[#allocation7 + $0xe4] ss:$8 sps:$4 sm:$0xff]  }
  0xab   :  { %1206 = vmatpush1.bf16.msra.mxu1 %v1871_v48 }
  0xac   :  { %1207 = vmatprep.subr.bf16.mxu1 %v1876_v50 }
  0xad   :  { %914 = vmatpush1.bf16.msra.mxu0 %v1756_v22  ;;  %v1900_v22 = vld [vmem:[#allocation7 + $0xf4] ss:$8 sps:$4 sm:$0xff]  }
  0xae   :  { %915 = vmatprep.subr.bf16.mxu0 %v1764_v24  ;;  %v1901_v24 = vld [vmem:[#allocation8 + $0x40] sm:$0xff]  }
  0xaf   :  { %1208 = vmatpush1.bf16.msra.mxu1 %v1874_v52 }
  0xb0   :  { %1209 = vmatprep.subr.bf16.mxu1 %v1879_v54  ;;  %v1902_v54 = vld [vmem:[#allocation8] sm:$0xff]  }
  0xb1   :  { %916 = vmatpush1.bf16.msra.mxu0 %v1762_v27 }
  0xb2   :  { %917 = vmatprep.subr.bf16.mxu0 %v1770_v29  ;;  %v205_v29 = vlaneseq }
  0xb3   :  { %1210 = vmatpush1.bf16.msra.mxu1 %v1877_v58  ;;  %v1906_v58 = vld [vmem:[#allocation8 + $0x10] sm:$0xff]  }
  0xb4   :  { %1211 = vmatprep.subr.bf16.mxu1 %v1882_v59  ;;  %v206_v30 = vshrl.u32 %v205_v29, 7  ;;  %v1907_v59 = vld [vmem:[#allocation8 + $0x58] sm:$0xff]  }
  0xb5   :  { %918 = vmatpush1.bf16.msra.mxu0 %v1768_v31 }
  0xb6   :  { %919 = vmatprep.subr.bf16.mxu0 %v1776_v33  ;;  %v207_v31 = vsub.s32 0, %v206_v30  ;;  %v211_v33 = vsub.s32 1, %v206_v30 }
  0xb7   :  { %1212 = vmatpush1.bf16.msra.mxu1 %v1880_v63  ;;  %v1911_v63 = vld [vmem:[#allocation8 + $0x68] sm:$0xff]  }
  0xb8   :  { %1213 = vmatprep.subr.bf16.mxu1 %v1885_v0  ;;  %v208_v34 = vrot.slane %v203_v32, %v207_v31  ;;  %v1912_v0 = vld [vmem:[#allocation8 + $0x28] sm:$0xff]  }
  0xb9   :  { %920 = vmatpush1.bf16.msra.mxu0 %v1774_v35  ;;  %v212_v35 = vrot.slane %v203_v32, %v211_v33 }
  0xba   :  { %921 = vmatprep.subr.bf16.mxu0 %v1782_v37 }
  0xbb   :  { %1214 = vmatpush1.bf16.msra.mxu1 %v1883_v3  ;;  %v1915_v3 = vld [vmem:[#allocation8 + $0x78] sm:$0xff]  }
  0xbc   :  { %1215 = vmatprep.subr.bf16.mxu1 %v1888_v4  ;;  %v1916_v4 = vld [vmem:[#allocation8 + $0x38] sm:$0xff]  }
  0xbd   :  { %922 = vmatpush1.bf16.msra.mxu0 %v1780_v39 }
  0xbe   :  { %923 = vmatprep.subr.bf16.mxu0 %v1788_v41 }
  0xbf   :  { %1216 = vmatpush1.bf16.msra.mxu1 %v1886_v7 }
  0xc0   :  { %1217 = vmatprep.subr.bf16.mxu1 %v1891_v17 }
  0xc1   :  { %924 = vmatpush1.bf16.msra.mxu0 %v1786_v43 }
  0xc2   :  { %925 = vmatprep.subr.bf16.mxu0 %v1794_v45 }
  0xc3   :  { %1218 = vmatpush1.bf16.msra.mxu1 %v1889_v16 }
  0xc4   :  { %1219 = vmatprep.subr.bf16.mxu1 %v1894_v19 }
  0xc5   :  { %926 = vmatpush1.bf16.msra.mxu0 %v1792_v47 }
  0xc6   :  { %927 = vmatprep.subr.bf16.mxu0 %v1800_v49 }
  0xc7   :  { %1220 = vmatpush1.bf16.msra.mxu1 %v1892_v18 }
  0xc8   :  { %1221 = vmatprep.subr.bf16.mxu1 %v1897_v20 }
  0xc9   :  { %928 = vmatpush1.bf16.msra.mxu0 %v1798_v51 }
  0xca   :  { %940 = vmatprep.subr.bf16.mxu0 %v1809_v53 }
  0xcb   :  { %1222 = vmatpush1.bf16.msra.mxu1 %v1895_v21 }
  0xcc   :  { %930 = vmatmul.mubr.bf16.vlgmr.msra.gmra.mrb[0].mxu0 %v1804_v55  ;;  %1223 = vmatprep.subr.bf16.mxu1 %v1900_v22  ;;  %v1903_v55 = vld [vmem:[#allocation8 + $0x48] sm:$0xff]  }
  0xcd   :  { %941 = vmatpush1.bf16.msra.mxu0 %v1807_v56  ;;  %972 = vmatprep.mubr.bf16.mxu0 %v2053_v61  ;;  %v1904_v56 = vld [vmem:[#allocation8 + $0x8] sm:$0xff]   ;;  %v1909_v61 = vld [vmem:[#allocation8 + $0x60] sm:$0xff]  }
  0xce   :  { %942 = vmatprep.subr.bf16.mxu0 %v1815_v57  ;;  %v1905_v57 = vld [vmem:[#allocation8 + $0x50] sm:$0xff]  }
  0xcf   :  { %1224 = vmatpush1.bf16.msra.mxu1 %v1898_v23 }
  0xd0   :  { %1625 = vmatprep.subr.bf16.mxu1 %v1901_v24  ;;  %v1608_v24 = vld [vmem:[%s2186_s6] ss:$0 sm:$0xff]  ;;  %s2054_s6 = smov [#allocation10]  }
  0xd1   :  { %943 = vmatpush1.bf16.msra.mxu0 %v1813_v60  ;;  %v1908_v60 = vld [vmem:[#allocation8 + $0x18] sm:$0xff]   ;;  %s1443_s10 = sshll.u32 %s2054_s6, 4  ;;  %s1444_s10 = int_to_ptr.vmem [resolvable:$true] %s1443_s10 }
  0xd2   :  { %944 = vmatprep.subr.bf16.mxu0 %v1821_v62  ;;  %v1910_v62 = vld [vmem:[#allocation8 + $0x20] sm:$0xff]   ;;  %s2013_s13 = scalar_lea.vmem %s1444_s10, 256  ;;  %p2018_p5 = scmp.lt.s32.totalorder %s1444_s10, %s1444_s10 }
  0xd3   :  { %p2014_p4 = scmp.ne.s32.totalorder %s1444_s10, %s2013_s13  ;;  %p2019_p6 = scmp.lt.s32.totalorder %s2013_s13, %s2013_s13 }
  0xd5   :  { %945 = vmatpush1.bf16.msra.mxu0 %v1819_v1  ;;  %v1913_v1 = vld [vmem:[#allocation8 + $0x70] sm:$0xff]   ;;  %p2020_p7 = por %p2019_p6, %p2018_p5 }
  0xd6   :  { %946 = vmatprep.subr.bf16.mxu0 %v1827_v2  ;;  %v1914_v2 = vld [vmem:[#allocation8 + $0x30] sm:$0xff]  }
  0xd7   :  { %p2021_p8 = pnand %p2020_p7, %p2014_p4 }
  0xd9   :  { %947 = vmatpush1.bf16.msra.mxu0 %v1825_v5  ;;  %v1021_v5 = vld [vmem:[%s2184_s4] sm:$0x3] }
  0xda   :  { %948 = vmatprep.subr.bf16.mxu0 %v1833_v6  ;;  %v1026_v6 = vrot.slane %v1021_v5, %v207_v31  ;;  %v1030_v7 = vrot.slane %v1021_v5, %v211_v33 }
  0xdd   :  { %949 = vmatpush1.bf16.msra.mxu0 %v1831_v8 }
  0xde   :  { %950 = vmatprep.subr.bf16.mxu0 %v1839_v9 }
  0xe1   :  { %951 = vmatpush1.bf16.msra.mxu0 %v1837_v10 }
  0xe2   :  { %952 = vmatprep.subr.bf16.mxu0 %v1845_v11 }
  0xe5   :  { %953 = vmatpush1.bf16.msra.mxu0 %v1843_v12 }
  0xe6   :  { %954 = vmatprep.subr.bf16.mxu0 %v1851_v13 }
  0xe9   :  { %955 = vmatpush1.bf16.msra.mxu0 %v1849_v14 }
  0xec   :  { %973 = vmatmul.mubr.bf16.vlgmr.msra.gmra.mrb[0].mxu0 %v1852_v15 }
 0x165   :  { %v845_v25 = vpop.f32.mrb[0].mxu1 }
 0x166   :  { %v847_v26 = vpop.f32.mrb[1].mxu1  ;;  %v846_v36 = vadd.f32 %v845_v25, %v208_v34 }
 0x167   :  { %v849_v27 = vpop.f32.mrb[2].mxu1  ;;  %v848_v37 = vadd.f32 %v847_v26, %v212_v35 }
 0x168   :  { %v851_v28 = vpop.f32.mrb[3].mxu1  ;;  %v850_v39 = vadd.f32 %v849_v27, %v208_v34 }
 0x169   :  { %v852_v42 = vadd.f32 %v851_v28, %v212_v35 }
 0x1bf   :  { %v974_v38 = vpop.f32.mrb[0].mxu0 }
 0x1c0   :  { %v1648_v40 = vadd.f32 %v974_v38, %v846_v36  ;;  %v976_v41 = vpop.f32.mrb[1].mxu0 }
 0x1c1   :  { %v1650_v43 = vadd.f32 %v976_v41, %v848_v37  ;;  %v978_v44 = vpop.f32.mrb[2].mxu0 }
 0x1c2   :  { %v1652_v45 = vadd.f32 %v978_v44, %v850_v39  ;;  %v980_v46 = vpop.f32.mrb[3].mxu0  ;;  %v983_v48 = vmax.f32 %v1648_v40, 0.0 }
 0x1c3   :  { %v1654_v47 = vadd.f32 %v980_v46, %v852_v42  ;;  %v984_v50 = vmax.f32 %v1650_v43, 0.0 }
 0x1c4   :  { %v985_v49 = vmax.f32 %v1652_v45, 0.0 }
 0x1c5   :  { %v986_v51 = vmax.f32 %v1654_v47, 0.0 }
 0x1c6   :  { %v987_v52 = vpack.c.bf16 %v985_v49, %v983_v48 }
 0x1c7   :  { %v988_v53 = vpack.c.bf16 %v986_v51, %v984_v50 }
 0x1c9   :  { %1225 = vmatprep.mubr.bf16.mxu1 %v988_v53 }
 0x1ca   :  { %1226 = vmatmul.mubr.bf16.vlgmr.msra.gmra.mrb[4].mxu1 %v987_v52 }
 0x1cb   :  { %1626 = vmatpush3.bf16.msra.mxu1 %v1902_v54 }
 0x1cc   :  { %1627 = vmatprep.subr.bf16.mxu1 %v1903_v55 }
 0x1cf   :  { %1628 = vmatpush3.bf16.msra.mxu1 %v1904_v56 }
 0x1d0   :  { %1629 = vmatprep.subr.bf16.mxu1 %v1905_v57 }
 0x1d3   :  { %1630 = vmatpush3.bf16.msra.mxu1 %v1906_v58 }
 0x1d4   :  { %1631 = vmatprep.subr.bf16.mxu1 %v1907_v59 }
 0x1d7   :  { %1632 = vmatpush3.bf16.msra.mxu1 %v1908_v60 }
 0x1d8   :  { %1633 = vmatprep.subr.bf16.mxu1 %v1909_v61 }
 0x1db   :  { %1634 = vmatpush3.bf16.msra.mxu1 %v1910_v62 }
 0x1dc   :  { %1635 = vmatprep.subr.bf16.mxu1 %v1911_v63 }
 0x1df   :  { %1636 = vmatpush3.bf16.msra.mxu1 %v1912_v0 }
 0x1e0   :  { %1637 = vmatprep.subr.bf16.mxu1 %v1913_v1 }
 0x1e3   :  { %1638 = vmatpush3.bf16.msra.mxu1 %v1914_v2 }
 0x1e4   :  { %1639 = vmatprep.subr.bf16.mxu1 %v1915_v3 }
 0x1e7   :  { %1640 = vmatpush3.bf16.msra.mxu1 %v1916_v4 }
 0x29d   :  { %v1227_v8 = vpop.f32.mrb[4].mxu1 }
 0x29e   :  { %v1228_v9 = vadd.f32 %v1227_v8, %v1026_v6  ;;  %v1229_v10 = vpop.f32.mrb[5].mxu1 }
 0x29f   :  { %v1230_v11 = vadd.f32 %v1229_v10, %v1030_v7  ;;  %v1231_v12 = vpop.f32.mrb[6].mxu1 }
 0x2a0   :  { %v1232_v13 = vadd.f32 %v1231_v12, %v1026_v6  ;;  %v1233_v14 = vpop.f32.mrb[7].mxu1  ;;  %v1236_v16 = vmax.f32 %v1228_v9, 0.0 }
 0x2a1   :  { %v1234_v15 = vadd.f32 %v1233_v14, %v1030_v7  ;;  %v1237_v18 = vmax.f32 %v1230_v11, 0.0 }
 0x2a2   :  { %v1238_v17 = vmax.f32 %v1232_v13, 0.0 }
 0x2a3   :  { %v1239_v19 = vmax.f32 %v1234_v15, 0.0 }
 0x2a4   :  { %v1240_v20 = vpack.c.bf16 %v1238_v17, %v1236_v16 }
 0x2a5   :  { %v1241_v21 = vpack.c.bf16 %v1239_v19, %v1237_v18 }
 0x2a7   :  { %1409 = vmatprep.mubr.bf16.mxu1 %v1241_v21 }
 0x2a8   :  { %1410 = vmatmul.mubr.bf16.vlgmr.msra.gmra.mrb[8].mxu1 %v1240_v20 }
 0x37b   :  { %v1641_v22 = vpop.f32.mrb[8].mxu1 }
 0x37c   :  { %v1642_v23 = vpop.f32.mrb[9].mxu1 }
 0x37d   :  { %v1643_v25 = vadd.f32 %v1642_v23, %v1641_v22  ;;  %v1644_v26 = vpop.f32.mrb[10].mxu1 }
 0x37e   :  { %v1645_v27 = vpop.f32.mrb[11].mxu1 }
 0x37f   :  { %v1646_v28 = vadd.f32 %v1645_v27, %v1644_v26  ;;  %v1412_v29 = vadd.f32 %v1643_v25, %v1608_v24 }
 0x381   :  { %1418 = vmax.xlane.f32.xlu0 %v1412_v29  ;;  %v1415_v30 = vadd.f32 %v1646_v28, %v1608_v24 }
 0x385   :  { %1420 = vmax.xlane.f32.xlu0 %v1415_v30 }
 0x40e   :  { %v1419_v31 = vpop.xlane.xlu0 %1418 }
 0x40f   :  { %v1422_v32 = vsub.f32 %v1412_v29, %v1419_v31 }
 0x411   :  { %v1424_v33 = vmul.f32 1.442695, %v1422_v32 }
 0x412   :  { %v1421_v34 = vpop.xlane.xlu0 %1420 }
 0x413   :  { %1917 = vpow2.f32 %v1424_v33  ;;  %v1423_v35 = vsub.f32 %v1415_v30, %v1421_v34 }
 0x415   :  { %v1426_v36 = vmul.f32 1.442695, %v1423_v35 }
 0x417   :  { %1919 = vpow2.f32 %v1426_v36 }
 0x41d   :  { %v1918_v37 = vpop.eup %1917 }
 0x41e   :  { %1428 = vadd.xlane.f32.xlu1 %v1918_v37 }
 0x421   :  { %v1920_v38 = vpop.eup %1919 }
 0x422   :  { %1430 = vadd.xlane.f32.xlu1 %v1920_v38 }
 0x4ab   :  { %v1429_v39 = vpop.xlane.xlu1 %1428 }
 0x4ac   :  { %1921 = vrcp.f32 %v1429_v39 }
 0x4af   :  { %v1431_v40 = vpop.xlane.xlu1 %1430 }
 0x4b0   :  { %1923 = vrcp.f32 %v1431_v40 }
 0x4b6   :  { %v1922_v41 = vpop.eup %1921 }
 0x4b7   :  { %v1433_v42 = vmul.f32 %v1922_v41, %v1918_v37 }
 0x4b9   :  { %1436 = vst [vmem:[#allocation10] sm:$0xff] %v1433_v42 }
 0x4ba   :  { %v1924_v43 = vpop.eup %1923 }
 0x4bb   :  { %v1435_v44 = vmul.f32 %v1924_v43, %v1920_v38 }
 0x4bd   :  { %1437 = vst [vmem:[#allocation10 + $0x8] sm:$0xff] %v1435_v44 }
 0x4be   :  { %2024 = shalt.err (!%p2021_p8)
}
 0x4bf   :  { %s2025_s17 = scalar_lea.hbm %s2187_s7, 256 }
 0x4c0   :  { %p2026_p9 = scmp.ne.s32.totalorder %s2187_s7, %s2025_s17  ;;  %p2029_p10 = scmp.lt.u32.totalorder %s2025_s17, %s2187_s7 }
 0x4c2   :  { %p2031_p11 = pnand %p2029_p10, %p2026_p9 }
 0x4c4   :  { %2034 = shalt.err (!%p2031_p11)
}
 0x4c5   :  { %1449 = dma.vmem_to_hbm [thread:$0]  %s1444_s10, 256, %s2187_s7, [#allocation4], %s2044_s11, %s2044_s11, %s2045_s12  }
 0x4c6   :  { %2041 = dma.done.wait [#allocation4], 256  }
 0x4c7   :  { %2042 = vsyncadd [#allocation4], 4294967040 }
 0x4c8   :  { %1453 = vsyncpa [#allocation3], 1 }
 0x4c9   :  { %1454 = vsyncpa [#allocation6], 1 }
 0x4ca   :  { %1455 = vsyncpa [#allocation9], 1 }
 0x4cb   :  { %1456 = vsyncpa [#allocation4], 1 }

</bundles_post_ra>
